<compile_context>
chip_gen: v5e
topology: v5e:2x2
jax: 0.10.0
libtpu: 0.0.40
codegen_flags: <defaults>
</compile_context>

<pallas_src>
import jax
import jax.numpy as jnp
from jax.experimental import pallas as pl
from jax.experimental.pallas import tpu as pltpu


_NEG_INIT = -1e30  # large finite negative init for the running max (avoids -inf math)

_VMEM_CACHE = []


def _tpu_vmem_bytes():
    """Best-effort physical VMEM capacity query; conservative fallback (v7x-sized)."""
    if _VMEM_CACHE:
        return _VMEM_CACHE[0]
    cap = 64 * 1024 * 1024
    try:
        info = pltpu.get_tpu_info()
        for attr in ("vmem_capacity_bytes", "vmem_bytes", "vmem_size_bytes"):
            v = getattr(info, attr, None)
            if v:
                cap = int(v)
                break
    except Exception:
        pass
    _VMEM_CACHE.append(cap)
    return cap


def _make_class_loss_kernel(weighted, n_total):
    def kernel(preds_ref, labels_ref, *rest):
        if weighted:
            sw_ref, loss_ref, count_ref, m_run, s_run, t_run = rest
        else:
            sw_ref = None
            loss_ref, count_ref, m_run, s_run, t_run = rest

        ni = pl.program_id(0)
        ci = pl.program_id(1)
        nc = pl.num_programs(1)

        # Per-N-block init of the online-logsumexp running state.
        @pl.when(ci == 0)
        def _():
            m_run[...] = jnp.full(m_run.shape, _NEG_INIT, jnp.float32)
            s_run[...] = jnp.zeros(s_run.shape, jnp.float32)
            t_run[...] = jnp.zeros(t_run.shape, jnp.float32)

        logits = preds_ref[...].astype(jnp.float32)   # (tn, tc) f32 (bf16 upcast on load)
        labels = labels_ref[...]                      # (tn, 1) i32
        tn, tc = logits.shape

        # One-hot "gather" of the target logit for the classes held in this C tile.
        # Compare the raw lane iota against (labels - ci*tc): (tn,1) subtract instead
        # of a full-tile i32 add (saves a VALU op/element + a tile-sized temp).
        local_label = labels - ci * tc                # (tn, 1) i32
        col = jax.lax.broadcasted_iota(jnp.int32, (tn, tc), 1)
        onehot = col == local_label

        # Online (streaming) logsumexp over the class axis.
        m_prev = m_run[...]
        m_new = jnp.maximum(m_prev, jnp.max(logits, axis=-1, keepdims=True))
        p = jnp.exp(logits - m_new)
        s_run[...] = (s_run[...] * jnp.exp(m_prev - m_new)
                      + jnp.sum(p, axis=-1, keepdims=True))
        t_run[...] = t_run[...] + jnp.sum(jnp.where(onehot, logits, 0.0),
                                          axis=-1, keepdims=True)
        m_run[...] = m_new

        # Finalize this N block on the last C step: emit per-block partial sums
        # (N axis is "parallel", so no cross-block accumulation in-kernel).
        @pl.when(ci == nc - 1)
        def _():
            rows = ni * tn + jax.lax.broadcasted_iota(jnp.int32, (tn, 1), 0)
            # ignore_index = -1 AND mask ragged rows past N (preds is NOT padded).
            valid = jnp.logical_and(labels >= 0, rows < n_total)
            lse = m_run[...] + jnp.log(s_run[...])
            per = lse - t_run[...]                                # (tn, 1)
            if weighted:
                per = per * sw_ref[...].astype(jnp.float32)       # loss.mul(sampleWeight)
            per = jnp.where(valid, per, 0.0)
            loss_ref[...] = jnp.full(loss_ref.shape, jnp.sum(per), jnp.float32)
            count_ref[...] = jnp.full(count_ref.shape,
                                      jnp.sum(valid.astype(jnp.int32)), jnp.int32)

    return kernel


def class_loss(preds, labels, sample_weight=None, use_sample_weight=False,
               *, block_n=None, block_c=None):
    """Returns (loss_sum: f32 scalar, num_valid: i32 scalar)."""
    N, C = preds.shape
    labels2d = labels.astype(jnp.int32).reshape(N, 1)
    weighted = bool(use_sample_weight and sample_weight is not None)
    sw2d = (sample_weight.reshape(-1).astype(jnp.float32).reshape(N, 1)
            if weighted else None)

    itemsize = jnp.dtype(preds.dtype).itemsize
    sublane = {4: 8, 2: 16, 1: 32}.get(itemsize, 8)

    # ---- generation-gated VMEM budgeting ----
    big_vmem = _tpu_vmem_bytes() >= 96 * 1024 * 1024           # v5e/v6e: 128 MiB
    tile_budget = (8 if big_vmem else 3) * 1024 * 1024         # preds bytes per tile
    tn_cap = 4096 if big_vmem else 1024                        # v7x: keep temps small
    vmem_limit = (96 if big_vmem else 32) * 1024 * 1024

    # ---- class-axis tile: full C unless C is very large; prefer big tc ----
    if block_c is not None:
        tc = int(block_c)
        if tc != C and (C % tc != 0 or tc % 128 != 0):
            raise ValueError("block_c must divide C and be a multiple of 128 (or == C); "
                             "prefer large values (>=1024) over 128-256")
    else:
        tc = C
        if C > 4096:
            for cand in (4096, 2048, 1024, 512, 256, 128):
                if C % cand == 0:
                    tc = cand
                    break

    # ---- batch-axis tile: rounded to the dtype sublane multiple ----
    if block_n is not None:
        tn = max(sublane, (int(block_n) // sublane) * sublane)
    else:
        budget_rows = tile_budget // max(1, tc * itemsize)
        tn = int(min(max(sublane, budget_rows), tn_cap))
        tn = max(sublane, (tn // sublane) * sublane)
    if tn >= N:
        tn = N   # block == full array dim is always a legal block shape

    n_blocks = -(-N // tn)          # ragged last block handled by in-kernel row mask
    grid = (n_blocks, C // tc)

    in_specs = [
        pl.BlockSpec((tn, tc), lambda i, j: (i, j)),   # preds tile (dominant stream)
        pl.BlockSpec((tn, 1), lambda i, j: (i, 0)),    # labels (per N block)
    ]
    args = [preds, labels2d]
    if weighted:
        in_specs.append(pl.BlockSpec((tn, 1), lambda i, j: (i, 0)))
        args.append(sw2d)

    # Per-N-block partial outputs: one lane-dense (8,128) slab per block so the N
    # axis can be "parallel" (v7x megacore) and writes are unmasked full vst's.
    out_shape = (jax.ShapeDtypeStruct((n_blocks, 8, 128), jnp.float32),
                 jax.ShapeDtypeStruct((n_blocks, 8, 128), jnp.int32))
    out_specs = (pl.BlockSpec((1, 8, 128), lambda i, j: (i, 0, 0)),
                 pl.BlockSpec((1, 8, 128), lambda i, j: (i, 0, 0)))

    loss_parts, count_parts = pl.pallas_call(
        _make_class_loss_kernel(weighted, N),
        out_shape=out_shape,
        grid_spec=pltpu.PrefetchScalarGridSpec(
            num_scalar_prefetch=0,
            grid=grid,
            in_specs=in_specs,
            out_specs=out_specs,
            scratch_shapes=[pltpu.VMEM((tn, 1), jnp.float32),   # running max
                            pltpu.VMEM((tn, 1), jnp.float32),   # running sum(exp)
                            pltpu.VMEM((tn, 1), jnp.float32)],  # running target logit
        ),
        compiler_params=pltpu.CompilerParams(
            # N blocks are independent (partial outputs) -> parallel; C is the
            # streamed reduction axis -> arbitrary, kept last in the grid.
            dimension_semantics=("parallel", "arbitrary"),
            vmem_limit_bytes=vmem_limit,
        ),
    )(*args)

    loss = jnp.sum(loss_parts[:, 0, 0])
    count = jnp.sum(count_parts[:, 0, 0])
    return loss, count


def _reference(preds, labels, sample_weight=None, use_sample_weight=False):
    # pure-JAX reference of nn.CrossEntropyLoss(reduction='none', ignore_index=-1)
    logsm = jax.nn.log_softmax(preds.astype(jnp.float32), axis=-1)
    safe = jnp.clip(labels, 0, preds.shape[1] - 1)
    nll = -jnp.take_along_axis(logsm, safe[:, None], axis=-1)[:, 0]
    valid = labels >= 0
    per = jnp.where(valid, nll, 0.0)
    if use_sample_weight and sample_weight is not None:
        per = per * sample_weight.reshape(-1)
    return per.sum(), valid.sum()


if __name__ == "__main__":
    key = jax.random.PRNGKey(0)
    k1, k2, k3 = jax.random.split(key, 3)

    # small demo shape consistent with CrossEntropyLoss over (batch, classes)
    N, C = 8, 32
    preds = jax.random.normal(k1, (N, C), dtype=jnp.float32)
    labels = jax.random.randint(k2, (N,), 0, C, dtype=jnp.int32)
    labels = labels.at[1].set(-1).at[5].set(-1)               # ignored samples
    sample_weight = jax.random.uniform(k3, (N, 1), dtype=jnp.float32)

    # unweighted path (useSampleWeight=False)
    loss, count = class_loss(preds, labels)
    jax.block_until_ready((loss, count))
    ref_loss, ref_count = _reference(preds, labels)
    assert jnp.allclose(loss, ref_loss, rtol=1e-5, atol=1e-5), (loss, ref_loss)
    assert int(count) == int(ref_count)

    # weighted path (useSampleWeight=True)
    loss_w, count_w = class_loss(preds, labels, sample_weight, use_sample_weight=True)
    jax.block_until_ready((loss_w, count_w))
    ref_loss_w, ref_count_w = _reference(preds, labels, sample_weight, True)
    assert jnp.allclose(loss_w, ref_loss_w, rtol=1e-5, atol=1e-5), (loss_w, ref_loss_w)
    assert int(count_w) == int(ref_count_w)

    # bf16 ingestion (halves HBM bytes for the dominant stream); math stays f32
    loss_b, count_b = class_loss(preds.astype(jnp.bfloat16), labels)
    jax.block_until_ready((loss_b, count_b))
    ref_loss_b, ref_count_b = _reference(
        preds.astype(jnp.bfloat16).astype(jnp.float32), labels)
    assert jnp.allclose(loss_b, ref_loss_b, rtol=1e-4, atol=1e-3), (loss_b, ref_loss_b)
    assert int(count_b) == int(ref_count_b)

    # exercise the tiled path: ragged N (44 rows, tn=16 -> 3 blocks, last block
    # masked in-kernel, no wrapper-side padding of preds) and C tiling with the
    # online logsumexp (grid = (3, 4)), weighted.
    k4, k5, k6 = jax.random.split(jax.random.PRNGKey(1), 3)
    N2, C2 = 44, 1024
    preds2 = jax.random.normal(k4, (N2, C2), dtype=jnp.float32)
    labels2 = jax.random.randint(k5, (N2,), -1, C2, dtype=jnp.int32)  # includes -1s
    sw2 = jax.random.uniform(k6, (N2, 1), dtype=jnp.float32)
    loss2, count2 = class_loss(preds2, labels2, sw2, use_sample_weight=True,
                               block_n=16, block_c=256)
    jax.block_until_ready((loss2, count2))
    ref_loss2, ref_count2 = _reference(preds2, labels2, sw2, True)
    assert jnp.allclose(loss2, ref_loss2, rtol=2e-5, atol=1e-3), (loss2, ref_loss2)
    assert int(count2) == int(ref_count2)

    # auto-tiled ragged path (default tn/tc heuristics, N not a multiple of 8)
    loss3, count3 = class_loss(preds2, labels2)
    jax.block_until_ready((loss3, count3))
    ref_loss3, ref_count3 = _reference(preds2, labels2)
    assert jnp.allclose(loss3, ref_loss3, rtol=2e-5, atol=1e-3), (loss3, ref_loss3)
    assert int(count3) == int(ref_count3)

    print("KERNEL_OK")
</pallas_src>

<mosaic_0001>
module attributes {stable_mosaic.version = 11 : i64} {
  func.func @kernel(%arg0: i32, %arg1: i32, %arg2: memref<8x32xf32, #tpu.memory_space<vmem>>, %arg3: memref<8x1xi32, #tpu.memory_space<vmem>>, %arg4: memref<1x8x128xf32, #tpu.memory_space<vmem>>, %arg5: memref<1x8x128xi32, #tpu.memory_space<vmem>>, %arg6: memref<8x1xf32, #tpu.memory_space<vmem>>, %arg7: memref<8x1xf32, #tpu.memory_space<vmem>>, %arg8: memref<8x1xf32, #tpu.memory_space<vmem>>) attributes {dimension_semantics = [#tpu.dimension_semantics<parallel>, #tpu.dimension_semantics<arbitrary>], iteration_bounds = array<i64: 1, 1>, scalar_prefetch = 0 : i64, scratch_operands = 3 : i64, tpu.core_type = #tpu.core_type<tc>, window_params = [{transform_indices = @transform_0, window_bounds = array<i64: 8, 32>}, {transform_indices = @transform_1, window_bounds = array<i64: 8, 1>}, {transform_indices = @transform_2, window_bounds = array<i64: 1, 8, 128>}, {transform_indices = @transform_3, window_bounds = array<i64: 1, 8, 128>}]} {
    %c0_i32 = arith.constant 0 : i32
    %0 = arith.cmpi eq, %arg1, %c0_i32 : i32
    %1 = arith.extui %0 : i1 to i32
    %c0_i32_0 = arith.constant 0 : i32
    %2 = arith.cmpi ne, %1, %c0_i32_0 : i32
    scf.if %2 {
      %cst_21 = arith.constant -1.000000e+30 : f32
      %37 = vector.broadcast %cst_21 : f32 to vector<8x1xf32>
      %c0_22 = arith.constant 0 : index
      %c0_23 = arith.constant 0 : index
      %38 = vector.load %arg6[%c0_22, %c0_23] : memref<8x1xf32, #tpu.memory_space<vmem>>, vector<8x1xf32>
      tpu.vector_store %arg6[%c0_22, %c0_23], %37 {strides = array<i32>} : memref<8x1xf32, #tpu.memory_space<vmem>>, vector<8x1xf32>,
      %cst_24 = arith.constant 0.000000e+00 : f32
      %39 = vector.broadcast %cst_24 : f32 to vector<8x1xf32>
      %c0_25 = arith.constant 0 : index
      %c0_26 = arith.constant 0 : index
      %40 = vector.load %arg7[%c0_25, %c0_26] : memref<8x1xf32, #tpu.memory_space<vmem>>, vector<8x1xf32>
      tpu.vector_store %arg7[%c0_25, %c0_26], %39 {strides = array<i32>} : memref<8x1xf32, #tpu.memory_space<vmem>>, vector<8x1xf32>,
      %cst_27 = arith.constant 0.000000e+00 : f32
      %41 = vector.broadcast %cst_27 : f32 to vector<8x1xf32>
      %c0_28 = arith.constant 0 : index
      %c0_29 = arith.constant 0 : index
      %42 = vector.load %arg8[%c0_28, %c0_29] : memref<8x1xf32, #tpu.memory_space<vmem>>, vector<8x1xf32>
      tpu.vector_store %arg8[%c0_28, %c0_29], %41 {strides = array<i32>} : memref<8x1xf32, #tpu.memory_space<vmem>>, vector<8x1xf32>,
    } else {
    }
    %c0 = arith.constant 0 : index
    %c0_1 = arith.constant 0 : index
    %3 = vector.load %arg2[%c0, %c0_1] : memref<8x32xf32, #tpu.memory_space<vmem>>, vector<8x32xf32>
    %c0_2 = arith.constant 0 : index
    %c0_3 = arith.constant 0 : index
    %4 = vector.load %arg3[%c0_2, %c0_3] : memref<8x1xi32, #tpu.memory_space<vmem>>, vector<8x1xi32>
    %c32_i32 = arith.constant 32 : i32
    %5 = arith.muli %arg1, %c32_i32 : i32
    %6 = vector.broadcast %5 : i32 to vector<8x1xi32>
    %7 = arith.subi %4, %6 : vector<8x1xi32>
    %8 = tpu.iota {dimensions = array<i32: 1>} : vector<8x32xi32>
    %9 = vector.broadcast %7 : vector<8x1xi32> to vector<8x32xi32>
    %10 = arith.cmpi eq, %8, %9 : vector<8x32xi32>
    %c0_4 = arith.constant 0 : index
    %c0_5 = arith.constant 0 : index
    %11 = vector.load %arg6[%c0_4, %c0_5] : memref<8x1xf32, #tpu.memory_space<vmem>>, vector<8x1xf32>
    %cst = arith.constant dense<0xFF800000> : vector<8xf32>
    %12 = vector.multi_reduction <maximumf>, %3, %cst [1] : vector<8x32xf32> to vector<8xf32>
    %13 = vector.shape_cast %12 : vector<8xf32> to vector<8x1xf32>
    %14 = arith.maximumf %11, %13 : vector<8x1xf32>
    %15 = vector.broadcast %14 : vector<8x1xf32> to vector<8x32xf32>
    %16 = arith.subf %3, %15 : vector<8x32xf32>
    %17 = math.exp %16 : vector<8x32xf32>
    %c0_6 = arith.constant 0 : index
    %c0_7 = arith.constant 0 : index
    %18 = vector.load %arg7[%c0_6, %c0_7] : memref<8x1xf32, #tpu.memory_space<vmem>>, vector<8x1xf32>
    %19 = arith.subf %11, %14 : vector<8x1xf32>
    %20 = math.exp %19 : vector<8x1xf32>
    %21 = arith.mulf %18, %20 : vector<8x1xf32>
    %cst_8 = arith.constant dense<0.000000e+00> : vector<8xf32>
    %22 = vector.multi_reduction <add>, %17, %cst_8 [1] : vector<8x32xf32> to vector<8xf32>
    %23 = vector.shape_cast %22 : vector<8xf32> to vector<8x1xf32>
    %24 = arith.addf %21, %23 : vector<8x1xf32>
    %c0_9 = arith.constant 0 : index
    %c0_10 = arith.constant 0 : index
    %25 = vector.load %arg7[%c0_9, %c0_10] : memref<8x1xf32, #tpu.memory_space<vmem>>, vector<8x1xf32>
    tpu.vector_store %arg7[%c0_9, %c0_10], %24 {strides = array<i32>} : memref<8x1xf32, #tpu.memory_space<vmem>>, vector<8x1xf32>,
    %c0_11 = arith.constant 0 : index
    %c0_12 = arith.constant 0 : index
    %26 = vector.load %arg8[%c0_11, %c0_12] : memref<8x1xf32, #tpu.memory_space<vmem>>, vector<8x1xf32>
    %cst_13 = arith.constant 0.000000e+00 : f32
    %27 = vector.broadcast %cst_13 : f32 to vector<8x32xf32>
    %28 = arith.select %10, %3, %27 : vector<8x32xi1>, vector<8x32xf32>
    %cst_14 = arith.constant dense<0.000000e+00> : vector<8xf32>
    %29 = vector.multi_reduction <add>, %28, %cst_14 [1] : vector<8x32xf32> to vector<8xf32>
    %30 = vector.shape_cast %29 : vector<8xf32> to vector<8x1xf32>
    %31 = arith.addf %26, %30 : vector<8x1xf32>
    %c0_15 = arith.constant 0 : index
    %c0_16 = arith.constant 0 : index
    %32 = vector.load %arg8[%c0_15, %c0_16] : memref<8x1xf32, #tpu.memory_space<vmem>>, vector<8x1xf32>
    tpu.vector_store %arg8[%c0_15, %c0_16], %31 {strides = array<i32>} : memref<8x1xf32, #tpu.memory_space<vmem>>, vector<8x1xf32>,
    %c0_17 = arith.constant 0 : index
    %c0_18 = arith.constant 0 : index
    %33 = vector.load %arg6[%c0_17, %c0_18] : memref<8x1xf32, #tpu.memory_space<vmem>>, vector<8x1xf32>
    tpu.vector_store %arg6[%c0_17, %c0_18], %14 {strides = array<i32>} : memref<8x1xf32, #tpu.memory_space<vmem>>, vector<8x1xf32>,
    %c0_i32_19 = arith.constant 0 : i32
    %34 = arith.cmpi eq, %arg1, %c0_i32_19 : i32
    %35 = arith.extui %34 : i1 to i32
    %c0_i32_20 = arith.constant 0 : i32
    %36 = arith.cmpi ne, %35, %c0_i32_20 : i32
    scf.if %36 {
      %c8_i32 = arith.constant 8 : i32
      %37 = arith.muli %arg0, %c8_i32 : i32
      %38 = tpu.iota {dimensions = array<i32: 0>} : vector<8x1xi32>
      %39 = vector.broadcast %37 : i32 to vector<8x1xi32>
      %40 = arith.addi %39, %38 : vector<8x1xi32>
      %c0_i32_21 = arith.constant 0 : i32
      %41 = vector.broadcast %c0_i32_21 : i32 to vector<8x1xi32>
      %42 = arith.cmpi sge, %4, %41 : vector<8x1xi32>
      %c8_i32_22 = arith.constant 8 : i32
      %43 = vector.broadcast %c8_i32_22 : i32 to vector<8x1xi32>
      %44 = arith.cmpi slt, %40, %43 : vector<8x1xi32>
      %45 = arith.andi %42, %44 : vector<8x1xi1>
      %c0_23 = arith.constant 0 : index
      %c0_24 = arith.constant 0 : index
      %46 = vector.load %arg6[%c0_23, %c0_24] : memref<8x1xf32, #tpu.memory_space<vmem>>, vector<8x1xf32>
      %c0_25 = arith.constant 0 : index
      %c0_26 = arith.constant 0 : index
      %47 = vector.load %arg7[%c0_25, %c0_26] : memref<8x1xf32, #tpu.memory_space<vmem>>, vector<8x1xf32>
      %48 = math.log %47 : vector<8x1xf32>
      %49 = arith.addf %46, %48 : vector<8x1xf32>
      %c0_27 = arith.constant 0 : index
      %c0_28 = arith.constant 0 : index
      %50 = vector.load %arg8[%c0_27, %c0_28] : memref<8x1xf32, #tpu.memory_space<vmem>>, vector<8x1xf32>
      %51 = arith.subf %49, %50 : vector<8x1xf32>
      %cst_29 = arith.constant 0.000000e+00 : f32
      %52 = vector.broadcast %cst_29 : f32 to vector<8x1xf32>
      %53 = arith.select %45, %51, %52 : vector<8x1xi1>, vector<8x1xf32>
      %54 = vector.shape_cast %53 : vector<8x1xf32> to vector<1x8x1xf32>
      %cst_30 = arith.constant dense<0.000000e+00> : vector<1xf32>
      %55 = vector.multi_reduction <add>, %54, %cst_30 [1, 2] : vector<1x8x1xf32> to vector<1xf32>
      %56 = vector.shape_cast %55 : vector<1xf32> to vector<1x1x1xf32>
      %57 = vector.extract %56[0, 0, 0] : f32 from vector<1x1x1xf32>
      %58 = vector.broadcast %57 : f32 to vector<1x8x128xf32>
      %c0_31 = arith.constant 0 : index
      %c0_32 = arith.constant 0 : index
      %c0_33 = arith.constant 0 : index
      %59 = vector.load %arg4[%c0_31, %c0_32, %c0_33] : memref<1x8x128xf32, #tpu.memory_space<vmem>>, vector<1x8x128xf32>
      tpu.vector_store %arg4[%c0_31, %c0_32, %c0_33], %58 {strides = array<i32>} : memref<1x8x128xf32, #tpu.memory_space<vmem>>, vector<1x8x128xf32>,
      %60 = arith.extui %45 : vector<8x1xi1> to vector<8x1xi32>
      %61 = vector.shape_cast %60 : vector<8x1xi32> to vector<1x8x1xi32>
      %cst_34 = arith.constant dense<0> : vector<1xi32>
      %62 = vector.multi_reduction <add>, %61, %cst_34 [1, 2] : vector<1x8x1xi32> to vector<1xi32>
      %63 = vector.shape_cast %62 : vector<1xi32> to vector<1x1x1xi32>
      %64 = vector.extract %63[0, 0, 0] : i32 from vector<1x1x1xi32>
      %65 = vector.broadcast %64 : i32 to vector<1x8x128xi32>
      %c0_35 = arith.constant 0 : index
      %c0_36 = arith.constant 0 : index
      %c0_37 = arith.constant 0 : index
      %66 = vector.load %arg5[%c0_35, %c0_36, %c0_37] : memref<1x8x128xi32, #tpu.memory_space<vmem>>, vector<1x8x128xi32>
      tpu.vector_store %arg5[%c0_35, %c0_36, %c0_37], %65 {strides = array<i32>} : memref<1x8x128xi32, #tpu.memory_space<vmem>>, vector<1x8x128xi32>,
    } else {
    }
    return
  }
  func.func @transform_0(%arg0: i32, %arg1: i32) -> (i32, i32) {
    %c0_i32 = arith.constant 0 : i32
    return %arg0, %arg1 : i32, i32
  }
  func.func @transform_1(%arg0: i32, %arg1: i32) -> (i32, i32) {
    %c0_i32 = arith.constant 0 : i32
    %c0_i32_0 = arith.constant 0 : i32
    return %arg0, %c0_i32 : i32, i32
  }
  func.func @transform_2(%arg0: i32, %arg1: i32) -> (i32, i32, i32) {
    %c0_i32 = arith.constant 0 : i32
    %c0_i32_0 = arith.constant 0 : i32
    %c0_i32_1 = arith.constant 0 : i32
    return %arg0, %c0_i32, %c0_i32_0 : i32, i32, i32
  }
  func.func @transform_3(%arg0: i32, %arg1: i32) -> (i32, i32, i32) {
    %c0_i32 = arith.constant 0 : i32
    %c0_i32_0 = arith.constant 0 : i32
    %c0_i32_1 = arith.constant 0 : i32
    return %arg0, %c0_i32, %c0_i32_0 : i32, i32, i32
  }
}

</mosaic_0001>

<bundles_post_ra>
// kernel: tpu_custom_call.1
= control target key start
LH: loop header
LB: loop body
LE: loop exit
PB: predicated region body
PF: predicated region fallthrough
CT: control target
= control target key end

     0   :  { %9 = vsyncpa [#allocation6], 0  ;;  %vm35_vm0 = vcmask 261120   ;;  %s272_s0 = inlined_call_operand.vmem [shape: f32[8,32], index: 0, kind: input, shape index: {}]   ;;  %s273_s1 = inlined_call_operand.vmem [shape: s32[8,1], index: 1, kind: input, shape index: {}]   ;;  %s274_s2 = inlined_call_operand.hbm [shape: f32[1,8,128], index: 2, kind: output, shape index: {0}]   ;;  %s275_s3 = inlined_call_operand.hbm [shape: s32[1,8,128], index: 3, kind: output, shape index: {1}]  }
   0x1   :  { %v23_v0 = vld [vmem:[%s272_s0] sm:$0xff] }
   0x2   :  { %10 = vsyncpa [#allocation8], 0  ;;  %v36_v1 = vsel %vm35_vm0, %v23_v0, -inf  ;;  %vm19_vm1 = vcmask 7168   ;;  %v222_v2 = vmov -1e+30   ;;  %v28_v10 = vlaneseq }
   0x3   :  { %37 = vmax.xlane.f32.xlu0 %v36_v1  ;;  %20 = vst.msk [vmem:[#allocation2] sm:$0xff] %vm19_vm1, %v222_v2  ;;  %v223_v3 = vmov 0   ;;  %v224_v4 = vmov 0.0   ;;  %v24_v5 = vld [vmem:[%s273_s1] sm:$0xff]  ;;  %s225_s0 = smov [#allocation5]   ;;  %s128_s18 = sshll.u32 %s274_s2, 4  ;;  %s129_s18 = int_to_ptr.hbm [resolvable:$true] %s128_s18 }
   0x4   :  { %162 = vset.pattern.permute.xlu0 %v223_v3  ;;  %163 = vset.pattern.permute.xlu1 %v223_v3  ;;  %21 = vst.msk [vmem:[#allocation3] sm:$0xff] %vm19_vm1, %v224_v4  ;;  %vm75_vm2 = vcmp.ge.s32.totalorder %v24_v5, 0  ;;  %v29_v13 = vand.u32 127, %v28_v10  ;;  %s126_s1 = sshll.u32 %s225_s0, 4  ;;  %s226_s19 = smov [#allocation7]   ;;  %s127_s1 = int_to_ptr.vmem [resolvable:$true] %s126_s1 }
   0x5   :  { %22 = vst.msk [vmem:[#allocation4] sm:$0xff] %vm19_vm1, %v224_v4  ;;  %31 = vperm.xlu1 %163, %v24_v5   ;;  %v98_v11 = vsel %vm75_vm2, 1, %v223_v3  ;;  %s137_s20 = sshll.u32 %s226_s19, 4  ;;  %s139_s23 = sshll.u32 %s275_s3, 4  ;;  %s138_s20 = int_to_ptr.vmem [resolvable:$true] %s137_s20  ;;  %s140_s23 = int_to_ptr.hbm [resolvable:$true] %s139_s23 }
   0x6   :  { %v99_v14 = vsel %vm19_vm1, %v98_v11, 0 }
   0x7   :  { %v101_v17 = vshrl.u32 %v99_v14, 16  ;;  %v100_v24 = vand.u32 65535, %v99_v14 }
   0x9   :  { %v103_v18 = vcvt.s32.f32 %v101_v17  ;;  %v102_v25 = vcvt.s32.f32 %v100_v24 }
   0xa   :  { %v34_v6 = vld [vmem:[#allocation2] sm:$0xff] }
   0xb   :  { %v48_v31 = vld [vmem:[#allocation3] sm:$0xff] }
   0xc   :  { %v59_v26 = vld [vmem:[#allocation4] sm:$0xff] }
  0x76   :  { %v38_v7 = vpop.xlane.xlu0 %37 }
  0x77   :  { %v39_v8 = vmax.f32 %v34_v6, %v38_v7  ;;  %v32_v12 = vpop.permute.xlu1 %31 }
  0x78   :  { %vm33_vm3 = vcmp.eq.s32.totalorder %v29_v13, %v32_v12 }
  0x79   :  { %v49_v9 = vsub.f32 %v34_v6, %v39_v8  ;;  %66 = vst.msk [vmem:[#allocation2] sm:$0xff] %vm19_vm1, %v39_v8  ;;  %42 = vperm.xlu0 %162, %v39_v8   ;;  %v60_v15 = vsel %vm33_vm3, %v23_v0, 0.0 }
  0x7a   :  { %v61_v16 = vsel %vm35_vm0, %v60_v15, 0.0 }
  0x7b   :  { %62 = vadd.xlane.f32.xlu2 %v61_v16  ;;  %v50_v29 = vmul.f32 1.442695, %v49_v9 }
  0x80   :  { %v78_v38 = vld [vmem:[#allocation2] sm:$0xff] }
  0x83   :  { %106 = vadd.xlane.f32.xlu2 %v103_v18 }
  0x8b   :  { %104 = vadd.xlane.f32.xlu2 %v102_v25 }
  0xeb   :  { %v43_v19 = vpop.permute.xlu0 %42 }
  0xec   :  { %v45_v20 = vsub.f32 %v23_v0, %v43_v19 }
  0xee   :  { %v46_v21 = vmul.f32 1.442695, %v45_v20  ;;  %v63_v27 = vpop.xlane.xlu2 %62 }
  0xef   :  { %v64_v28 = vadd.f32 %v63_v27, %v59_v26 }
  0xf0   :  { %164 = vpow2.f32 %v46_v21 }
  0xf1   :  { %65 = vst.msk [vmem:[#allocation4] sm:$0xff] %vm19_vm1, %v64_v28  ;;  %166 = vpow2.f32 %v50_v29 }
  0xf6   :  { %v165_v22 = vpop.eup %164  ;;  %v107_v44 = vpop.xlane.xlu2 %106 }
  0xf7   :  { %v53_v23 = vsel %vm35_vm0, %v165_v22, 0.0  ;;  %v167_v30 = vpop.eup %166  ;;  %v109_v45 = vcvt.f32.s32 %v107_v44 }
  0xf8   :  { %54 = vadd.xlane.f32.xlu1 %v53_v23  ;;  %v52_v32 = vmul.f32 %v167_v30, %v48_v31  ;;  %v83_v39 = vld [vmem:[#allocation4] sm:$0xff] }
  0xf9   :  { %v110_v47 = vshll.u32 %v109_v45, 16 }
  0xfe   :  { %v105_v46 = vpop.xlane.xlu2 %104 }
  0xff   :  { %v108_v48 = vcvt.f32.s32 %v105_v46 }
 0x101   :  { %v111_v49 = vadd.s32 %v110_v47, %v108_v48 }
 0x103   :  { %v112_v50 = vrot.slane %v111_v49, 4 }
 0x105   :  { %v113_v51 = vadd.s32 %v112_v50, %v111_v49 }
 0x107   :  { %v114_v53 = vrot.slane %v113_v51, 2 }
 0x109   :  { %v115_v56 = vadd.s32 %v114_v53, %v113_v51 }
 0x10b   :  { %v116_v59 = vrot.slane %v115_v56, 1 }
 0x10d   :  { %v117_v62 = vadd.s32 %v116_v59, %v115_v56 }
 0x16b   :  { %v55_v33 = vpop.xlane.xlu1 %54 }
 0x16c   :  { %v56_v34 = vadd.f32 %v55_v33, %v52_v32 }
 0x16e   :  { %58 = vst.msk [vmem:[#allocation3] sm:$0xff] %vm19_vm1, %v56_v34 }
 0x175   :  { %v79_v35 = vld [vmem:[#allocation3] sm:$0xff] }
 0x176   :  { %168 = vlog2.f32 %v79_v35 }
 0x17c   :  { %v169_v36 = vpop.eup %168 }
 0x17d   :  { %v81_v37 = vmul.f32 0.6931472, %v169_v36 }
 0x17f   :  { %v82_v40 = vadd.f32 %v81_v37, %v78_v38 }
 0x181   :  { %v84_v41 = vsub.f32 %v82_v40, %v83_v39 }
 0x183   :  { %v85_v42 = vsel %vm75_vm2, %v84_v41, 0.0 }
 0x184   :  { %v86_v43 = vsel %vm19_vm1, %v85_v42, 0.0 }
 0x185   :  { %87 = vadd.xlane.f32.xlu2 %v86_v43 }
 0x1f8   :  { %v88_v52 = vpop.xlane.xlu2 %87 }
 0x1f9   :  { %v89_v54 = vrot.slane %v88_v52, 4 }
 0x1fb   :  { %v90_v55 = vadd.f32 %v89_v54, %v88_v52 }
 0x1fd   :  { %v91_v57 = vrot.slane %v90_v55, 2 }
 0x1ff   :  { %v92_v58 = vadd.f32 %v91_v57, %v90_v55 }
 0x201   :  { %v93_v60 = vrot.slane %v92_v58, 1 }
 0x203   :  { %v94_v61 = vadd.f32 %v93_v60, %v92_v58 }
 0x205   :  { %153 = vpush %v94_v61 }
 0x206   :  { %155 = vpush %v117_v62 }
 0x236   :  { %s154_s24 = spop %153 }
 0x237   :  { %v96_v63 = vstv %s154_s24  ;;  %s156_s25 = spop %155 }
 0x238   :  { %97 = vst [vmem:[#allocation5] sm:$0xff] %v96_v63  ;;  %v119_v0 = vstv %s156_s25 }
 0x239   :  { %120 = vst [vmem:[#allocation7] sm:$0xff] %v119_v0  ;;  %131 = dma.vmem_to_hbm [thread:$0]  %s127_s1, 128, %s129_s18, [#allocation6]  }
 0x23a   :  { %142 = dma.vmem_to_hbm [thread:$0]  %s138_s20, 128, %s140_s23, [#allocation8]  }
 0x23b   :  { %218 = dma.done.wait [#allocation6], 128  }
 0x23c   :  { %219 = vsyncadd [#allocation6], 4294967168 }
 0x23d   :  { %220 = dma.done.wait [#allocation8], 128  }
 0x23e   :  { %221 = vsyncadd [#allocation8], 4294967168 }
 0x23f   :  { %151 = vsyncpa [#allocation6], 1 }
 0x240   :  { %152 = vsyncpa [#allocation8], 1 }

</bundles_post_ra>
